<compile_context>
chip_gen: v6e
topology: v6e:2x2x1
jax: 0.10.0
libtpu: 0.0.40
codegen_flags: <defaults>
</compile_context>

<pallas_src>
import functools

import jax
import jax.numpy as jnp
import numpy as np
from jax.experimental import pallas as pl
from jax.experimental.pallas import tpu as pltpu

LANE = 128   # TPU lane width / MXU tile edge


def _round_up(x, m):
    return (x + m - 1) // m * m


# ----------------------------- Pallas kernel ------------------------------ #

def _columnar_layer_kernel(prev_ref, w_ref, out_ref, acc_ref, *,
                           num_segments, seg_threshold, branch_threshold):
    """Grid = (M tiles, branch tiles, K tiles); K (last axis) is the reduction.

    prev_ref : (tb, tk)        bf16 activations in {0, 1}
    w_ref    : (tk, S*128)     bf16 synapse-count slice (segment-major layout)
    out_ref  : (tb, 128)       bf16 branch activations for this branch tile
    acc_ref  : (tb, S*128)     f32 VMEM accumulator, resident across K
    """
    k = pl.program_id(2)

    @pl.when(k == 0)
    def _init():
        acc_ref[...] = jnp.zeros_like(acc_ref)

    acc_ref[...] += jnp.dot(prev_ref[...], w_ref[...],
                            preferred_element_type=jnp.float32)

    @pl.when(k == pl.num_programs(2) - 1)
    def _finalize():
        seg_on = (acc_ref[...] >= seg_threshold).astype(jnp.float32)
        # Segment-major layout: columns [s*128, (s+1)*128) hold segment s of the
        # 128 branches of this tile -> branch pooling = S aligned lane slices.
        branch_sum = seg_on[:, 0:LANE]
        for s in range(1, num_segments):
            branch_sum = branch_sum + seg_on[:, s * LANE:(s + 1) * LANE]
        out_ref[...] = ((branch_sum >= branch_threshold)
                        .astype(jnp.float32).astype(out_ref.dtype))


def columnar_layer(prev_pad, w, *, num_segments, seg_threshold,
                   branch_threshold, tb=128, tk=None):
    """One Layer->Column->Type->Branch step on the MXU/VPU.

    prev_pad : (B_pad, N_prev_pad) bf16 {0,1}, B_pad % tb == 0, N_prev_pad % 128 == 0
    w        : (N_prev_pad, Nbt*S*128) bf16 synapse-count matrix
    Returns  : (B_pad, Nbt*128) bf16 padded, lane-dense branch activations.
    """
    S = num_segments
    B_pad, n_prev_pad = prev_pad.shape
    n_cols = w.shape[1]
    assert w.shape[0] == n_prev_pad and n_cols % (S * LANE) == 0
    n_branch_tiles = n_cols // (S * LANE)

    if tk is None:  # biggest 128-multiple K tile that divides N_prev_pad (<=512)
        tk = next(t for t in (512, 256, 128) if n_prev_pad % t == 0)
    assert B_pad % tb == 0 and n_prev_pad % tk == 0

    grid = (B_pad // tb, n_branch_tiles, n_prev_pad // tk)

    kernel = functools.partial(
        _columnar_layer_kernel,
        num_segments=S,
        seg_threshold=float(seg_threshold),
        branch_threshold=float(branch_threshold))

    # Double-buffered in/out blocks + the f32 accumulator, with headroom;
    # capped at 48 MiB so it also fits v7x's 64 MiB VMEM.
    block_bytes = (2 * (tb * tk * 2 + tk * S * LANE * 2 + tb * LANE * 2)
                   + tb * S * LANE * 4)
    vmem_limit = int(min(max(4 * block_bytes, 8 << 20), 48 << 20))

    flops = 2 * B_pad * n_prev_pad * n_cols + B_pad * n_cols
    bytes_accessed = (prev_pad.size * 2 * n_branch_tiles
                      + w.size * 2 * (B_pad // tb)
                      + B_pad * n_branch_tiles * LANE * 2)

    return pl.pallas_call(
        kernel,
        out_shape=jax.ShapeDtypeStruct((B_pad, n_branch_tiles * LANE),
                                       jnp.bfloat16),
        grid_spec=pltpu.PrefetchScalarGridSpec(
            num_scalar_prefetch=0,
            grid=grid,
            in_specs=[
                pl.BlockSpec((tb, tk), lambda i, j, k: (i, k)),
                pl.BlockSpec((tk, S * LANE), lambda i, j, k: (k, j)),
            ],
            out_specs=pl.BlockSpec((tb, LANE), lambda i, j, k: (i, j)),
            scratch_shapes=[pltpu.VMEM((tb, S * LANE), jnp.float32)],
        ),
        compiler_params=pltpu.CompilerParams(
            dimension_semantics=("parallel", "parallel", "arbitrary"),
            vmem_limit_bytes=vmem_limit),
        cost_estimate=pl.CostEstimate(
            flops=flops, transcendentals=0, bytes_accessed=bytes_accessed),
    )(prev_pad, w)


# --------------------------- parameter setup glue -------------------------- #

def build_count_matrix(idx, n_prev_pad, dtype=jnp.bfloat16):
    """idx: (C, T, Br, S, K) int32, -1 = unconnected.

    Returns (n_prev_pad, Nbt*S*128) with segment-major per-128-branch-tile
    column layout: col = (branch//128 * S + s) * 128 + branch % 128.
    Built with a scatter-add (no one-hot blowup).
    """
    C, T, Br, S, K = idx.shape
    n_branch = C * T * Br
    n_branch_tiles = _round_up(n_branch, LANE) // LANE

    flat = idx.reshape(n_branch, S, K)
    branch = jnp.arange(n_branch)
    col = (((branch[:, None] // LANE) * S + jnp.arange(S)[None, :]) * LANE
           + branch[:, None] % LANE)                       # (n_branch, S)
    col = jnp.broadcast_to(col[:, :, None], (n_branch, S, K))

    valid = flat >= 0
    rows = jnp.where(valid, flat, 0)

    w = jnp.zeros((n_prev_pad, n_branch_tiles * S * LANE), jnp.float32)
    w = w.at[rows.ravel(), col.ravel()].add(valid.astype(jnp.float32).ravel())
    return w.astype(dtype)


class ColumnarNetworkPallas:
    """Mirror of the PyTorch ColumnarNetwork (use_sparse_matrix=True)."""

    def __init__(self, *, num_layers, num_columns, num_types, num_branches,
                 num_segments, num_synapses, input_size, seg_threshold,
                 branch_threshold, key):
        self.num_layers = num_layers
        self.C, self.T, self.Br = num_columns, num_types, num_branches
        self.S, self.K = num_segments, num_synapses
        self.input_size = input_size
        self.seg_threshold = seg_threshold
        self.branch_threshold = branch_threshold

        self.n_branch = self.C * self.T * self.Br
        self.n_branch_pad = _round_up(self.n_branch, LANE)
        self.input_pad = _round_up(input_size, LANE)

        self.connection_indices = []   # raw idx parameters (like nn.ParameterList)
        self.count_matrices = []       # bf16 dense equivalents fed to the kernel
        for l in range(1, num_layers):
            n_prev = input_size if l == 1 else self.n_branch
            n_prev_pad = self.input_pad if l == 1 else self.n_branch_pad
            key, sub = jax.random.split(key)
            # deterministic synthetic connectivity: indices in [-1, n_prev)
            idx = jax.random.randint(
                sub, (self.C, self.T, self.Br, self.S, self.K),
                minval=-1, maxval=n_prev, dtype=jnp.int32)
            self.connection_indices.append(idx)
            self.count_matrices.append(build_count_matrix(idx, n_prev_pad))

    def forward(self, x):
        """x: (B, input_size) binary {0,1}. Returns (trace[-1][:, :, 0].int(), trace)."""
        B = x.shape[0]
        B_pad = _round_up(max(B, 1), LANE)     # pad M to the MXU height

        act_bool = x.astype(bool)              # trace[0]: (B, input_size)
        trace = [act_bool]

        prev = jnp.zeros((B_pad, self.input_pad), jnp.bfloat16)
        prev = prev.at[:B, :self.input_size].set(x.astype(jnp.bfloat16))

        # TODO(synk): fuse layers 2..L (identical shapes) into a single
        # pallas_call with a layer grid axis and a VMEM-resident activation to
        # drop per-layer launches and HBM roundtrips.
        for l in range(1, self.num_layers):
            prev = columnar_layer(
                prev, self.count_matrices[l - 1],
                num_segments=self.S,
                seg_threshold=self.seg_threshold,
                branch_threshold=self.branch_threshold)
            act_bool = (prev[:B, :self.n_branch] > 0.5).reshape(
                B, self.C, self.T, self.Br)
            trace.append(act_bool)

        return trace[-1][:, :, 0].astype(jnp.int32), trace


# ------------------------- pure-JAX reference check ------------------------ #

def ref_forward_sparse(prev_bool, idx, seg_threshold, branch_threshold):
    B = prev_bool.shape[0]
    prev = prev_bool.reshape(B, -1)
    C, T, Br, S, K = idx.shape
    flat = idx.reshape(-1, K)
    gathered = jnp.where(flat >= 0, prev[:, jnp.clip(flat, 0)], False)
    gathered = gathered.reshape(B, C, T, Br, S, K)
    seg_sum = gathered.sum(-1)
    seg_on = seg_sum >= seg_threshold
    branch_sum = seg_on.sum(-1)
    return branch_sum >= branch_threshold


# ---------------------------------- main ----------------------------------- #

if __name__ == "__main__":
    # Small, module-consistent config that still exercises K-accumulation
    # (input pads to 384 -> 3 K-tiles) and multiple branch tiles (144 -> 256).
    num_layers, num_columns, num_types = 3, 6, 4
    num_branches, num_segments, num_synapses = 6, 3, 5
    input_size, seg_threshold, branch_threshold = 300, 2, 1
    batch = 2

    key = jax.random.PRNGKey(0)
    key, kx, kp = jax.random.split(key, 3)

    x = jax.random.bernoulli(kx, 0.5, (batch, input_size)).astype(jnp.int32)

    net = ColumnarNetworkPallas(
        num_layers=num_layers, num_columns=num_columns, num_types=num_types,
        num_branches=num_branches, num_segments=num_segments,
        num_synapses=num_synapses, input_size=input_size,
        seg_threshold=seg_threshold, branch_threshold=branch_threshold, key=kp)

    out, trace = net.forward(x)
    out = jax.block_until_ready(out)

    # Correctness check against a pure-JAX gather-based reference of the
    # PyTorch sparse forward.
    ref_act = x.astype(bool)
    ref_trace = [ref_act]
    for l in range(1, num_layers):
        ref_act = ref_forward_sparse(ref_act, net.connection_indices[l - 1],
                                     seg_threshold, branch_threshold)
        ref_trace.append(ref_act)
    ref_out = ref_trace[-1][:, :, 0].astype(jnp.int32)

    np.testing.assert_array_equal(np.asarray(out), np.asarray(ref_out))
    for got, want in zip(trace, ref_trace):
        np.testing.assert_array_equal(np.asarray(got), np.asarray(want))

    print("KERNEL_OK")
</pallas_src>

<mosaic_0001>
module attributes {stable_mosaic.version = 11 : i64} {
  func.func @_columnar_layer_kernel(%arg0: i32, %arg1: i32, %arg2: i32, %arg3: memref<128x128xbf16, #tpu.memory_space<vmem>>, %arg4: memref<128x384xbf16, #tpu.memory_space<vmem>>, %arg5: memref<128x128xbf16, #tpu.memory_space<vmem>>, %arg6: memref<128x384xf32, #tpu.memory_space<vmem>>) attributes {dimension_semantics = [#tpu.dimension_semantics<parallel>, #tpu.dimension_semantics<parallel>, #tpu.dimension_semantics<arbitrary>], iteration_bounds = array<i64: 1, 2, 3>, scalar_prefetch = 0 : i64, scratch_operands = 1 : i64, tpu.core_type = #tpu.core_type<tc>, window_params = [{transform_indices = @transform_0, window_bounds = array<i64: 128, 128>}, {transform_indices = @transform_1, window_bounds = array<i64: 128, 384>}, {transform_indices = @transform_2, window_bounds = array<i64: 128, 128>}]} {
    %c0_i32 = arith.constant 0 : i32
    %0 = arith.cmpi eq, %arg2, %c0_i32 : i32
    %1 = arith.extui %0 : i1 to i32
    %c0_i32_0 = arith.constant 0 : i32
    %2 = arith.cmpi ne, %1, %c0_i32_0 : i32
    scf.if %2 {
      %cst_9 = arith.constant 0.000000e+00 : f32
      %12 = vector.broadcast %cst_9 : f32 to vector<128x384xf32>
      %c0_10 = arith.constant 0 : index
      %c0_11 = arith.constant 0 : index
      %13 = vector.load %arg6[%c0_10, %c0_11] : memref<128x384xf32, #tpu.memory_space<vmem>>, vector<128x384xf32>
      tpu.vector_store %arg6[%c0_10, %c0_11], %12 {strides = array<i32>} : memref<128x384xf32, #tpu.memory_space<vmem>>, vector<128x384xf32>,
    } else {
    }
    %c0 = arith.constant 0 : index
    %c0_1 = arith.constant 0 : index
    %3 = vector.load %arg6[%c0, %c0_1] : memref<128x384xf32, #tpu.memory_space<vmem>>, vector<128x384xf32>
    %c0_2 = arith.constant 0 : index
    %c0_3 = arith.constant 0 : index
    %4 = vector.load %arg3[%c0_2, %c0_3] : memref<128x128xbf16, #tpu.memory_space<vmem>>, vector<128x128xbf16>
    %c0_4 = arith.constant 0 : index
    %c0_5 = arith.constant 0 : index
    %5 = vector.load %arg4[%c0_4, %c0_5] : memref<128x384xbf16, #tpu.memory_space<vmem>>, vector<128x384xbf16>
    %cst = arith.constant dense<0.000000e+00> : vector<128x384xf32>
    %6 = tpu.matmul %4, %5, %cst {dimension_numbers = #tpu.dot_dimension_numbers<[1], [0], [0], [1], [0, 0, 1, 1], [], []>} : vector<128x128xbf16>, vector<128x384xbf16>, vector<128x384xf32> -> vector<128x384xf32>
    %7 = arith.addf %3, %6 : vector<128x384xf32>
    %c0_6 = arith.constant 0 : index
    %c0_7 = arith.constant 0 : index
    %8 = vector.load %arg6[%c0_6, %c0_7] : memref<128x384xf32, #tpu.memory_space<vmem>>, vector<128x384xf32>
    tpu.vector_store %arg6[%c0_6, %c0_7], %7 {strides = array<i32>} : memref<128x384xf32, #tpu.memory_space<vmem>>, vector<128x384xf32>,
    %c2_i32 = arith.constant 2 : i32
    %9 = arith.cmpi eq, %arg2, %c2_i32 : i32
    %10 = arith.extui %9 : i1 to i32
    %c0_i32_8 = arith.constant 0 : i32
    %11 = arith.cmpi ne, %10, %c0_i32_8 : i32
    scf.if %11 {
      %c0_9 = arith.constant 0 : index
      %c0_10 = arith.constant 0 : index
      %12 = vector.load %arg6[%c0_9, %c0_10] : memref<128x384xf32, #tpu.memory_space<vmem>>, vector<128x384xf32>
      %cst_11 = arith.constant 2.000000e+00 : f32
      %13 = vector.broadcast %cst_11 : f32 to vector<128x384xf32>
      %14 = arith.cmpf oge, %12, %13 : vector<128x384xf32>
      %15 = arith.extui %14 : vector<128x384xi1> to vector<128x384xi32>
      %16 = arith.sitofp %15 : vector<128x384xi32> to vector<128x384xf32>
      %17 = vector.extract_strided_slice %16 {offsets = [0, 0], sizes = [128, 128], strides = [1, 1]} : vector<128x384xf32> to vector<128x128xf32>
      %18 = vector.extract_strided_slice %16 {offsets = [0, 128], sizes = [128, 128], strides = [1, 1]} : vector<128x384xf32> to vector<128x128xf32>
      %19 = arith.addf %17, %18 : vector<128x128xf32>
      %20 = vector.extract_strided_slice %16 {offsets = [0, 256], sizes = [128, 128], strides = [1, 1]} : vector<128x384xf32> to vector<128x128xf32>
      %21 = arith.addf %19, %20 : vector<128x128xf32>
      %cst_12 = arith.constant 1.000000e+00 : f32
      %22 = vector.broadcast %cst_12 : f32 to vector<128x128xf32>
      %23 = arith.cmpf oge, %21, %22 : vector<128x128xf32>
      %24 = arith.extui %23 : vector<128x128xi1> to vector<128x128xi32>
      %25 = arith.sitofp %24 : vector<128x128xi32> to vector<128x128xf32>
      %26 = arith.truncf %25 : vector<128x128xf32> to vector<128x128xbf16>
      %c0_13 = arith.constant 0 : index
      %c0_14 = arith.constant 0 : index
      %27 = vector.load %arg5[%c0_13, %c0_14] : memref<128x128xbf16, #tpu.memory_space<vmem>>, vector<128x128xbf16>
      tpu.vector_store %arg5[%c0_13, %c0_14], %26 {strides = array<i32>} : memref<128x128xbf16, #tpu.memory_space<vmem>>, vector<128x128xbf16>,
    } else {
    }
    return
  }
  func.func @transform_0(%arg0: i32, %arg1: i32, %arg2: i32) -> (i32, i32) {
    %c0_i32 = arith.constant 0 : i32
    return %arg0, %arg2 : i32, i32
  }
  func.func @transform_1(%arg0: i32, %arg1: i32, %arg2: i32) -> (i32, i32) {
    %c0_i32 = arith.constant 0 : i32
    return %arg2, %arg1 : i32, i32
  }
  func.func @transform_2(%arg0: i32, %arg1: i32, %arg2: i32) -> (i32, i32) {
    %c0_i32 = arith.constant 0 : i32
    return %arg0, %arg1 : i32, i32
  }
}

</mosaic_0001>

<bundles_post_ra>
// kernel: tpu_custom_call.1
= control target key start
LH: loop header
LB: loop body
LE: loop exit
PB: predicated region body
PF: predicated region fallthrough
CT: control target
= control target key end

     0   :  { %s2426_s0 = inlined_call_operand.hbm [shape: bf16[128,384], index: 0, kind: input, shape index: {}]   ;;  %s2427_s1 = inlined_call_operand.hbm [shape: bf16[384,768], index: 1, kind: input, shape index: {}]   ;;  %s2428_s2 = inlined_call_operand.hbm [shape: bf16[128,256], index: 2, kind: output, shape index: {}]  }
   0x1   :  { %2439 = sst [smem:[#allocation21_spill]] %s2426_s0 }
   0x2   :  { %2440 = sst [smem:[#allocation22_spill]] %s2428_s2 }
   0x3   :  { %7 = vsyncpa [#allocation4], 0 }
   0x4   :  { %9 = vsyncpa [#allocation4 + $0x1], 0 }
   0x5   :  { %10 = vsyncpa [#allocation7], 0 }
   0x6   :  { %12 = vsyncpa [#allocation7 + $0x1], 0 }
   0x7   :  { %13 = vsyncpa [#allocation5], 0 }
   0x8   :  { %15 = vsyncpa [#allocation5 + $0x1], 0  ;;  %s2001_s9 = smov 0   ;;  %s2003_s10 = smov 0  }
   0x9   :  { %s2005_s11 = smov 0   ;;  %s2007_s12 = smov 0  }
   0xa   :  { %s2009_s13 = smov 0   ;;  %s2011_s14 = smov 0  }
   0xb   :  { %s2013_s15 = smov 0   ;;  %s2015_s16 = smov 0  }
   0xc   :  { %s2017_s17 = smov 0   ;;  %s2019_s18 = smov 0  }
   0xd   :  { %s2021_s19 = smov 0   ;;  %s2023_s20 = smov 0  }
   0xe   :  { %s2025_s21 = smov 0   ;;  %s2027_s22 = smov 0  }
   0xf LB: > { %2441 = sst [smem:[#allocation12_spill]] %s1938_s14  ;;  %s1356_s23 = sadd.s32 4294967295, %s1970_s22   ;;  %s1970_s22 = sphi %s2027_s22, %s21_s22   ;;  %s1966_s21 = sphi %s2025_s21, %s2477_s21   ;;  %s1962_s20 = sphi %s2023_s20, %s2476_s20   ;;  %s1958_s19 = sphi %s2021_s19, %s2475_s19   ;;  %s1954_s18 = sphi %s2019_s18, %s2474_s18   ;;  %s1950_s17 = sphi %s2017_s17, %s2473_s17   ;;  %s1946_s16 = sphi %s2015_s16, %s2485_s16   ;;  %s1942_s15 = sphi %s2013_s15, %s2484_s15   ;;  %s1938_s14 = sphi %s2011_s14, %s2471_s14   ;;  %s1934_s13 = sphi %s2009_s13, %s2483_s13   ;;  %s1930_s12 = sphi %s2007_s12, %s2482_s12   ;;  %s1926_s11 = sphi %s2005_s11, %s2481_s11   ;;  %s1922_s10 = sphi %s2003_s10, %s2480_s10   ;;  %s1918_s9 = sphi %s2001_s9, %s2479_s9  }
  0x10   : > { %2442 = sst [smem:[#allocation13_spill]] %s1950_s17  ;;  %s33_s24 = sadd.s32 1, %s1962_s20 }
  0x11   : > { %2443 = sst [smem:[#allocation14_spill]] %s1958_s19  ;;  %p2071_p0 = scmp.ge.s32.totalorder %s33_s24, 3 }
  0x12   : > { %2444 = sst [smem:[#allocation15_spill]] %s1962_s20  ;;  %s49_s26 = sadd.s32 1, %s1950_s17 }
  0x13   : > { %2445 = sst [smem:[#allocation16_spill]] %s1966_s21  ;;  %p56_p1 = scmp.ne.s32.totalorder %s1950_s17, %s1946_s16 }
  0x14   : > { %p2432_p2 = scmp.eq.s32.totalorder %s1970_s22, 0  ;;  %s2487_s24 = smov (%p2071_p0, %s33_s24), 0 }
  0x15   : > { %2447 = sst [smem:[#allocation17_spill]] %s2487_s24  ;;  %p62_p4 = scmp.ne.s32.totalorder %s1946_s16, %s1942_s15 }
  0x16   : > { %p2085_p3 = por %p2432_p2, %p56_p1  ;;  %s2092_s28 = ssub.s32 %s1962_s20, %s2487_s24 }
  0x17   : > { %p2094_p5 = scmp.eq.s32.totalorder %s1356_s23, 0  ;;  %p47_p6 = scmp.eq.s32.totalorder %s2092_s28, 0 }
  0x18   : > { %p2099_p7 = scmp.eq.s32.totalorder %s1356_s23, 5  ;;  %p1601_p9 = scmp.lt.s32.totalorder %s1970_s22, 6 }
  0x19   : > { %p2105_p8 = por %p2094_p5, %p62_p4  ;;  %s142_s5 = sand.u32 1, %s1950_s17  }
  0x1a   : > { %s2110_s4 = scalar_select %p47_p6, %s1950_s17, %s49_s26  }
  0x1b   : > { %s2451_s3 = scalar_select %p2105_p8, 1, 0 }
  0x1c   : > { %2452 = sst [smem:[#allocation18_spill]] %s2110_s4  ;;  %s1360_s6 = sshll.u32 %s142_s5, 6 }
  0x1d   : > { %s1361_s7 = sshll.u32 %s1962_s20, 6  ;;  %s2453_s0 = sld [smem:[#allocation21_spill]] }
  0x1e   : > { %s146_s2 = scalar_lea.vmem [#allocation3], %s1360_s6  ;;  %p2122_p10 = pnand %p1601_p9, %p2085_p3 }
  0x1f   : > { %s155_s23 = sshll.u32 %s146_s2, 4  ;;  %s143_s26 = scalar_lea.sflag [#allocation4], %s142_s5  ;;  %s156_s23 = int_to_ptr.vmem [resolvable:$true] %s155_s23 }
  0x20   : > { %p1768_p11 = pneg %p2122_p10  ;;  %s1779_s4 = scalar_lea.vmem %s156_s23, 1024 }
  0x21   : > { %p1780_p12 = scmp.ne.s32.totalorder %s156_s23, %s1779_s4  ;;  %s1972_s17 = smov [#allocation3]  }
  0x22   : > { %s1784_s8 = sshll.u32 %s1972_s17, 4  ;;  %s1785_s8 = int_to_ptr.vmem [resolvable:$false] %s1784_s8 }
  0x23   : > { %s154_s24 = scalar_lea.hbm %s2453_s0, %s1361_s7  ;;  %p1782_p13 = pnand %p1780_p12, %p1768_p11 }
  0x24   : > { %s1786_s6 = scalar_lea.vmem %s1785_s8, 2048  ;;  %p1787_p4 = scmp.lt.s32.totalorder %s156_s23, %s1785_s8 }
  0x25   : > { %p1783_p1 = pneg %p1782_p13  ;;  %p1788_p6 = scmp.lt.s32.totalorder %s1786_s6, %s1779_s4 }
  0x27   : > { %p1789_p2 = por %p1788_p6, %p1787_p4 }
  0x29   : > { %p1790_p8 = pnand %p1789_p2, %p1783_p1 }
  0x2b   : > { %1793 = shalt.err (!%p1790_p8)
}
  0x2c   : > { %s2434_s2 = smov 192   ;;  %s1974_s17 = smov 64  }
  0x2d   : > { %s1975_s27 = smov 4   ;;  %p1365_p2 = scmp.ge.s32.totalorder %s1970_s22, 1 }
  0x2e   : > { %1593 = dma.hbm_to_vmem [thread:$0]  (!%p2122_p10), %s154_s24, 1024, %s156_s23, %s143_s26, %s2434_s2, %s1974_s17, %s1975_s27  }
  0x2f   : > { %p187_p3 = scmp.lt.s32.totalorder %s1970_s22, 7  ;;  %s1357_s5 = sadd.s32 4294967294, %s1970_s22  }
  0x30   : > { %s36_s7 = sadd.s32 1, %s1966_s21  ;;  %s77_s15 = sadd.s32 1, %s1938_s14 }
  0x31   : > { %p2133_p8 = pnand %p1365_p2, %p187_p3  ;;  %s2489_s7 = smov (!%p2071_p0, %s36_s7), %s1966_s21 }
  0x32   : > { %p84_p11 = scmp.ne.s32.totalorder %s1938_s14, %s1934_s13  ;;  %p90_p10 = scmp.ne.s32.totalorder %s1934_s13, %s1930_s12 }
  0x33   : > { %p38_p12 = scmp.ge.s32.totalorder %s2489_s7, 2  ;;  %s105_s19 = sadd.s32 1, %s1926_s11 }
  0x34   : > { %p2456_p13 = scmp.eq.s32.totalorder %s1970_s22, 0  ;;  %p2156_p4 = por %p90_p10, %p2094_p5 }
  0x35   : > { %s2491_s7 = smov (%p38_p12, %s2489_s7), 0  ;;  %p115_p0 = scmp.ne.s32.totalorder %s1926_s11, %s1922_s10 }
  0x36   : > { %p2150_p1 = por %p84_p11, %p2456_p13  ;;  %2459 = sst [smem:[#allocation19_spill]] %s2491_s7 }
  0x37   : > { %p121_p6 = scmp.ne.s32.totalorder %s1922_s10, %s1918_s9  ;;  %s73_s12 = ssub.s32 %s1966_s21, %s2491_s7 }
  0x38   : > { %p122_p2 = scmp.eq.s32.totalorder %s1357_s5, 5  ;;  %s74_s25 = sor.u32 %s73_s12, %s2092_s28 }
  0x39   : > { %p103_p3 = scmp.eq.s32.totalorder %s73_s12, 0  ;;  %p75_p11 = scmp.eq.s32.totalorder %s74_s25, 0 }
  0x3a   : > { %p2171_p13 = por %p2099_p7, %p115_p0  ;;  %p2181_p5 = por %p122_p2, %p121_p6 }
  0x3b   : > { %s2176_s26 = scalar_select %p103_p3, %s1926_s11, %s105_s19  }
  0x3c   : > { %s2179_s8 = scalar_select %p75_p11, %s1938_s14, %s77_s15  }
  0x3d   : > { %s165_s17 = sand.u32 1, %s1938_s14   ;;  %s171_s2 = smul.u32 3, %s1966_s21 }
  0x3e   : > { %2461 = sst [smem:[#allocation20_spill]] %s2179_s8  ;;  %s1581_s27 = smul.u32 192, %s165_s17 }
  0x3f   : > { %p2191_p10 = pnand %p1601_p9, %p2150_p1  ;;  %s1582_s30 = smul.u32 96, %s1962_s20 }
  0x40   : > { %s169_s5 = scalar_lea.vmem [#allocation6], %s1581_s27  ;;  %s166_s8 = scalar_lea.sflag [#allocation7], %s165_s17 }
  0x41   : > { %s179_s19 = sshll.u32 %s169_s5, 4  ;;  %s176_s12 = sadd.s32 %s1582_s30, %s171_s2  ;;  %s180_s19 = int_to_ptr.vmem [resolvable:$true] %s179_s19 }
  0x42   : > { %s1364_s15 = sshll.u32 %s176_s12, 6  ;;  %p1796_p7 = pneg %p2191_p10 }
  0x43   : > { %s178_s7 = scalar_lea.hbm %s2427_s1, %s1364_s15  ;;  %s1807_s24 = scalar_lea.vmem %s180_s19, 3072 }
  0x44   : > { %p1808_p12 = scmp.ne.s32.totalorder %s180_s19, %s1807_s24  ;;  %s1976_s21 = smov [#allocation6]  }
  0x45   : > { %s1812_s14 = sshll.u32 %s1976_s21, 4  ;;  %s1813_s14 = int_to_ptr.vmem [resolvable:$false] %s1812_s14 }
  0x46   : > { %p1810_p9 = pnand %p1808_p12, %p1796_p7  ;;  %s1814_s20 = scalar_lea.vmem %s1813_s14, 6144 }
  0x47   : > { %p1815_p0 = scmp.lt.s32.totalorder %s180_s19, %s1813_s14  ;;  %p1816_p6 = scmp.lt.s32.totalorder %s1814_s20, %s1807_s24 }
  0x48   : > { %p1811_p1 = pneg %p1810_p9 }
  0x49   : > { %p1817_p2 = por %p1816_p6, %p1815_p0 }
  0x4b   : > { %p1818_p3 = pnand %p1817_p2, %p1811_p1 }
  0x4d   : > { %1821 = shalt.err (!%p1818_p3)
}
  0x4e   : > { %s1977_s2 = smov 384   ;;  %s1978_s0 = smov 12  }
  0x4f   : > { %s2464_s17 = smov 192   ;;  %191 = sbr.rel (%p2133_p8) target bundleno = 489 (0x1e9), region = 28 }
  0x50   : > { %1596 = dma.hbm_to_vmem [thread:$0]  (!%p2191_p10), %s178_s7, 3072, %s180_s19, %s166_s8, %s1977_s2, %s2464_s17, %s1978_s0  }
  0x51   : > { %s193_s27 = sand.u32 (!%p2133_p8), 1, %s1946_s16   ;;  %p2465_p11 = scmp.ne.s32.totalorder (!%p2133_p8), %s2451_s3, 0 }
  0x52   : > { %s1366_s21 = sshll.u32 (!%p2133_p8), %s193_s27, 6  ;;  %s194_s30 = scalar_lea.sflag (!%p2133_p8), [#allocation4], %s193_s27 }
  0x53   : > { %s2207_s5 = scalar_lea.vmem (!%p2133_p8), [#allocation3], %s1366_s21 }
  0x54   : > { %1905 = dma.done.wait (%p2465_p11), %s194_s30, 1024  }
  0x55   : > { %1907 = vsyncadd (%p2465_p11), %s194_s30, 4294966272  ;;  %s202_s14 = sand.u32 1, %s1934_s13  }
  0x56   : > { %s1583_s20 = smul.u32 192, %s202_s14  ;;  %s203_s7 = scalar_lea.sflag [#allocation7], %s202_s14 }
  0x58   : > { %s2214_s8 = scalar_lea.vmem [#allocation6], %s1583_s20 }
  0x59   : > { %1909 = dma.done.wait (%p2156_p4), %s203_s7, 3072  }
  0x5a   : > { %1911 = vsyncadd (%p2156_p4), %s203_s7, 4294964224  ;;  %s229_s4 = sand.u32 1, %s1922_s10   ;;  %p1368_p8 = scmp.ne.s32.totalorder %s1954_s18, 0 }
  0x5b   : > { %s1367_s28 = sshll.u32 %s229_s4, 6 }
  0x5c   : > { %s2223_s19 = scalar_lea.vmem [#allocation8], %s1367_s28  ;;  %240 = sbr.rel (%p1368_p8) target bundleno = 122 (0x7a), region = 40 }
  0x61   : > { %v1979_v0 = vmov 0.0  }
  0x62   : > { %241 = vst [vmem:[#allocation2 + $0xb0] sm:$0xff] %v1979_v0  ;;  %242 = vst [vmem:[#allocation2 + $0xd0] sm:$0xff] %v1979_v0 }
  0x63   : > { %243 = vst [vmem:[#allocation2 + $0x10] sm:$0xff] %v1979_v0  ;;  %244 = vst [vmem:[#allocation2 + $0x48] sm:$0xff] %v1979_v0 }
  0x64   : > { %245 = vst [vmem:[#allocation2 + $0x160] sm:$0xff] %v1979_v0  ;;  %246 = vst [vmem:[#allocation2 + $0x128] sm:$0xff] %v1979_v0 }
  0x65   : > { %247 = vst [vmem:[#allocation2 + $0x40] sm:$0xff] %v1979_v0  ;;  %248 = vst [vmem:[#allocation2 + $0x178] sm:$0xff] %v1979_v0 }
  0x66   : > { %249 = vst [vmem:[#allocation2 + $0x108] sm:$0xff] %v1979_v0  ;;  %250 = vst [vmem:[#allocation2 + $0x110] sm:$0xff] %v1979_v0 }
  0x67   : > { %251 = vst [vmem:[#allocation2 + $0x90] sm:$0xff] %v1979_v0  ;;  %252 = vst [vmem:[#allocation2 + $0x118] sm:$0xff] %v1979_v0 }
  0x68   : > { %253 = vst [vmem:[#allocation2 + $0x148] sm:$0xff] %v1979_v0  ;;  %254 = vst [vmem:[#allocation2 + $0x100] sm:$0xff] %v1979_v0 }
  0x69   : > { %255 = vst [vmem:[#allocation2 + $0x58] sm:$0xff] %v1979_v0  ;;  %256 = vst [vmem:[#allocation2 + $0xd8] sm:$0xff] %v1979_v0 }
  0x6a   : > { %257 = vst [vmem:[#allocation2 + $0x80] sm:$0xff] %v1979_v0  ;;  %258 = vst [vmem:[#allocation2 + $0x130] sm:$0xff] %v1979_v0 }
  0x6b   : > { %259 = vst [vmem:[#allocation2 + $0x138] sm:$0xff] %v1979_v0  ;;  %260 = vst [vmem:[#allocation2 + $0x120] sm:$0xff] %v1979_v0 }
  0x6c   : > { %261 = vst [vmem:[#allocation2 + $0xe0] sm:$0xff] %v1979_v0  ;;  %262 = vst [vmem:[#allocation2 + $0xa8] sm:$0xff] %v1979_v0 }
  0x6d   : > { %263 = vst [vmem:[#allocation2 + $0xb8] sm:$0xff] %v1979_v0  ;;  %264 = vst [vmem:[#allocation2 + $0x168] sm:$0xff] %v1979_v0 }
  0x6e   : > { %265 = vst [vmem:[#allocation2 + $0xe8] sm:$0xff] %v1979_v0  ;;  %266 = vst [vmem:[#allocation2 + $0xf8] sm:$0xff] %v1979_v0 }
  0x6f   : > { %267 = vst [vmem:[#allocation2 + $0x20] sm:$0xff] %v1979_v0  ;;  %268 = vst [vmem:[#allocation2 + $0x88] sm:$0xff] %v1979_v0 }
  0x70   : > { %269 = vst [vmem:[#allocation2 + $0xa0] sm:$0xff] %v1979_v0  ;;  %270 = vst [vmem:[#allocation2 + $0x170] sm:$0xff] %v1979_v0 }
  0x71   : > { %271 = vst [vmem:[#allocation2 + $0xf0] sm:$0xff] %v1979_v0  ;;  %272 = vst [vmem:[#allocation2 + $0x140] sm:$0xff] %v1979_v0 }
  0x72   : > { %273 = vst [vmem:[#allocation2 + $0x60] sm:$0xff] %v1979_v0  ;;  %274 = vst [vmem:[#allocation2 + $0xc8] sm:$0xff] %v1979_v0 }
  0x73   : > { %275 = vst [vmem:[#allocation2 + $0x28] sm:$0xff] %v1979_v0  ;;  %276 = vst [vmem:[#allocation2 + $0x38] sm:$0xff] %v1979_v0 }
  0x74   : > { %277 = vst [vmem:[#allocation2 + $0xc0] sm:$0xff] %v1979_v0  ;;  %278 = vst [vmem:[#allocation2 + $0x18] sm:$0xff] %v1979_v0 }
  0x75   : > { %279 = vst [vmem:[#allocation2 + $0x98] sm:$0xff] %v1979_v0  ;;  %280 = vst [vmem:[#allocation2 + $0x8] sm:$0xff] %v1979_v0 }
  0x76   : > { %281 = vst [vmem:[#allocation2] sm:$0xff] %v1979_v0  ;;  %282 = vst [vmem:[#allocation2 + $0x78] sm:$0xff] %v1979_v0 }
  0x77   : > { %283 = vst [vmem:[#allocation2 + $0x50] sm:$0xff] %v1979_v0  ;;  %284 = vst [vmem:[#allocation2 + $0x68] sm:$0xff] %v1979_v0 }
  0x78   : > { %285 = vst [vmem:[#allocation2 + $0x70] sm:$0xff] %v1979_v0  ;;  %286 = vst [vmem:[#allocation2 + $0x30] sm:$0xff] %v1979_v0 }
  0x79   : > { %287 = vst [vmem:[#allocation2 + $0x158] sm:$0xff] %v1979_v0  ;;  %288 = vst [vmem:[#allocation2 + $0x150] sm:$0xff] %v1979_v0 }
  0x7a PF: > { %v1726_v1 = vld [vmem:[%s2214_s8 + $0xac] ss:$12 sps:$4 sm:$0xff]   ;;  %v1728_v2 = vld [vmem:[%s2214_s8 + $0xa8] ss:$12 sps:$4 sm:$0xff]   ;;  %v1980_v3 = vmov 0   ;;  %v1752_v13 = vld [vmem:[%s2207_s5] sm:$0xff]  }
  0x7b   : > { %593 = vmatprep.mubr.bf16.mxu0 %v1980_v3  ;;  %561 = vmatprep.subr.bf16.mxu0 %v1726_v1  ;;  %v1729_v4 = vld [vmem:[%s2214_s8 + $0x94] ss:$12 sps:$4 sm:$0xff]   ;;  %v1731_v5 = vld [vmem:[%s2214_s8 + $0x90] ss:$12 sps:$4 sm:$0xff]   ;;  %v1734_v7 = vld [vmem:[%s2214_s8 + $0x78] ss:$12 sps:$4 sm:$0xff]  }
  0x7c   : > { %562 = vmatpush1.bf16.msra.mxu0 %v1728_v2  ;;  %v1732_v6 = vld [vmem:[%s2214_s8 + $0x7c] ss:$12 sps:$4 sm:$0xff]   ;;  %v1735_v8 = vld [vmem:[%s2214_s8 + $0x64] ss:$12 sps:$4 sm:$0xff]   ;;  %v1737_v10 = vld [vmem:[%s2214_s8 + $0x60] ss:$12 sps:$4 sm:$0xff]   ;;  %1565 = vmatprep.mubr.bf16.mxu1 %v1752_v13 }
  0x7d   : > { %563 = vmatprep.subr.bf16.mxu0 %v1729_v4  ;;  %v1747_v9 = vld [vmem:[%s2214_s8 + $0xb0] ss:$12 sps:$4 sm:$0xff]   ;;  %v1738_v11 = vld [vmem:[%s2214_s8 + $0x4c] ss:$12 sps:$4 sm:$0xff]   ;;  %v1740_v15 = vld [vmem:[%s2214_s8 + $0x48] ss:$12 sps:$4 sm:$0xff]  }
  0x7e   : > { %1549 = vmatprep.subr.bf16.mxu1 %v1747_v9  ;;  %v1751_v12 = vld [vmem:[%s2214_s8 + $0x98] ss:$12 sps:$4 sm:$0xff]   ;;  %v1753_v14 = vld [vmem:[%s2214_s8 + $0x80] ss:$12 sps:$4 sm:$0xff]   ;;  %v1754_v17 = vld [vmem:[%s2214_s8 + $0x68] ss:$12 sps:$4 sm:$0xff]  }
  0x7f   : > { %1550 = vmatpush3.bf16.msra.mxu1 %v1747_v9  ;;  %v1741_v16 = vld [vmem:[%s2214_s8 + $0x34] ss:$12 sps:$4 sm:$0xff]   ;;  %v1743_v18 = vld [vmem:[%s2214_s8 + $0x30] ss:$12 sps:$4 sm:$0xff]   ;;  %v1746_v21 = vld [vmem:[%s2214_s8 + $0x18] ss:$12 sps:$4 sm:$0xff]  }
  0x80   : > { %564 = vmatpush1.bf16.msra.mxu0 %v1731_v5  ;;  %1551 = vmatprep.subr.bf16.mxu1 %v1751_v12  ;;  %v1744_v19 = vld [vmem:[%s2214_s8 + $0x1c] ss:$12 sps:$4 sm:$0xff]   ;;  %v1748_v22 = vld [vmem:[%s2214_s8 + $0x4] ss:$12 sps:$4 sm:$0xff]   ;;  %v1750_v24 = vld [vmem:[%s2214_s8] ss:$12 sps:$4 sm:$0xff]  }
  0x81   : > { %565 = vmatprep.subr.bf16.mxu0 %v1732_v6  ;;  %v1756_v20 = vld [vmem:[%s2214_s8 + $0x50] ss:$12 sps:$4 sm:$0xff]   ;;  %v1757_v23 = vld [vmem:[%s2214_s8 + $0x38] ss:$12 sps:$4 sm:$0xff]   ;;  %v1759_v25 = vld [vmem:[%s2214_s8 + $0x20] ss:$12 sps:$4 sm:$0xff]  }
  0x82   : > { %v1760_v26 = vld [vmem:[%s2214_s8 + $0x8] ss:$12 sps:$4 sm:$0xff]   ;;  %v1761_v29 = vld [vmem:[%s2207_s5 + $0x18] sm:$0xff]   ;;  %v1762_v30 = vld [vmem:[%s2207_s5 + $0x20] sm:$0xff]   ;;  %p1401_p4 = scmp.ne.s32.totalorder %s1954_s18, 2 }
  0x83   : > { %1552 = vmatpush3.bf16.msra.mxu1 %v1751_v12  ;;  %v1755_v27 = vld [vmem:[%s2207_s5 + $0x8] sm:$0xff]   ;;  %v1758_v28 = vld [vmem:[%s2207_s5 + $0x10] sm:$0xff]   ;;  %v1765_v33 = vld [vmem:[%s2207_s5 + $0x38] sm:$0xff]  }
  0x84   : > { %566 = vmatpush1.bf16.msra.mxu0 %v1734_v7  ;;  %1553 = vmatprep.subr.bf16.mxu1 %v1753_v14  ;;  %v1764_v31 = vld [vmem:[%s2207_s5 + $0x30] sm:$0xff]   ;;  %v1763_v32 = vld [vmem:[%s2207_s5 + $0x28] sm:$0xff]   ;;  %v293_v42 = vld [vmem:[#allocation2 + $0x160] sm:$0xff] }
  0x85   : > { %567 = vmatprep.subr.bf16.mxu0 %v1735_v8  ;;  %v289_v34 = vld [vmem:[#allocation2 + $0xb0] sm:$0xff]  ;;  %v292_v39 = vld [vmem:[#allocation2 + $0x48] sm:$0xff]  ;;  %v295_v45 = vld [vmem:[#allocation2 + $0x40] sm:$0xff] }
  0x86   : > { %v290_v36 = vld [vmem:[#allocation2 + $0xd0] sm:$0xff]  ;;  %v296_v48 = vld [vmem:[#allocation2 + $0x178] sm:$0xff]  ;;  %v297_v49 = vld [vmem:[#allocation2 + $0x108] sm:$0xff] }
  0x87   : > { %1554 = vmatpush3.bf16.msra.mxu1 %v1753_v14  ;;  %v298_v52 = vld [vmem:[#allocation2 + $0x110] sm:$0xff]  ;;  %v300_v60 = vld [vmem:[#allocation2 + $0x118] sm:$0xff]  ;;  %v301_v0 = vld [vmem:[#allocation2 + $0x148] sm:$0xff] }
  0x88   : > { %568 = vmatpush1.bf16.msra.mxu0 %v1737_v10  ;;  %1555 = vmatprep.subr.bf16.mxu1 %v1754_v17  ;;  %v291_v54 = vld [vmem:[#allocation2 + $0x10] sm:$0xff]  ;;  %v294_v2 = vld [vmem:[#allocation2 + $0x128] sm:$0xff]  ;;  %v302_v6 = vld [vmem:[#allocation2 + $0x100] sm:$0xff] }
  0x89   : > { %569 = vmatprep.subr.bf16.mxu0 %v1738_v11  ;;  %v299_v58 = vld [vmem:[#allocation2 + $0x90] sm:$0xff]  ;;  %v309_v8 = vld [vmem:[#allocation2 + $0xe0] sm:$0xff]  ;;  %v304_v12 = vld [vmem:[#allocation2 + $0xd8] sm:$0xff] }
  0x8a   : > { %v303_v14 = vld [vmem:[#allocation2 + $0x58] sm:$0xff] }
  0x8b   : > { %1556 = vmatpush3.bf16.msra.mxu1 %v1754_v17 }
  0x8c   : > { %570 = vmatpush1.bf16.msra.mxu0 %v1740_v15  ;;  %1557 = vmatprep.subr.bf16.mxu1 %v1756_v20 }
  0x8d   : > { %571 = vmatprep.subr.bf16.mxu0 %v1741_v16 }
  0x8f   : > { %1558 = vmatpush3.bf16.msra.mxu1 %v1756_v20  ;;  %v312_v20 = vld [vmem:[#allocation2 + $0x168] sm:$0xff] }
  0x90   : > { %572 = vmatpush1.bf16.msra.mxu0 %v1743_v18  ;;  %1559 = vmatprep.subr.bf16.mxu1 %v1757_v23  ;;  %v305_v18 = vld [vmem:[#allocation2 + $0x80] sm:$0xff] }
  0x91   : > { %573 = vmatprep.subr.bf16.mxu0 %v1744_v19 }
  0x93   : > { %1560 = vmatpush3.bf16.msra.mxu1 %v1757_v23 }
  0x94   : > { %574 = vmatpush1.bf16.msra.mxu0 %v1746_v21  ;;  %1561 = vmatprep.subr.bf16.mxu1 %v1759_v25 }
  0x95   : > { %575 = vmatprep.subr.bf16.mxu0 %v1748_v22 }
  0x97   : > { %1562 = vmatpush3.bf16.msra.mxu1 %v1759_v25 }
  0x98   : > { %576 = vmatpush1.bf16.msra.mxu0 %v1750_v24  ;;  %1563 = vmatprep.subr.bf16.mxu1 %v1760_v26  ;;  %v307_v24 = vld [vmem:[#allocation2 + $0x138] sm:$0xff] }
  0x9b   : > { %594 = vmatmul.mubr.bf16.vlgmr.msra.gmra.mxu0 %v1752_v13  ;;  %1564 = vmatpush3.bf16.msra.mxu1 %v1760_v26  ;;  %v306_v26 = vld [vmem:[#allocation2 + $0x130] sm:$0xff] }
  0x9c   : > { %603 = vmatprep.mubr.bf16.mxu0 %v1980_v3 }
  0x9e   : > { %1566 = vmatmul.mubr.bf16.vlgmr.msra.gmra.mxu1 %v1755_v27 }
  0x9f   : > { %1569 = vmatprep.mubr.bf16.mxu1 %v1758_v28 }
  0xa3   : > { %604 = vmatmul.mubr.bf16.gmra.mxu0 %v1755_v27 }
  0xa4   : > { %613 = vmatprep.mubr.bf16.mxu0 %v1980_v3 }
  0xa6   : > { %1570 = vmatmul.mubr.bf16.gmra.mxu1 %v1761_v29 }
  0xa7   : > { %1573 = vmatprep.mubr.bf16.mxu1 %v1762_v30 }
  0xab   : > { %614 = vmatmul.mubr.bf16.gmra.mxu0 %v1758_v28 }
  0xac   : > { %623 = vmatprep.mubr.bf16.mxu0 %v1980_v3 }
  0xae   : > { %1574 = vmatmul.mubr.bf16.gmra.mxu1 %v1763_v32 }
  0xaf   : > { %1577 = vmatprep.mubr.bf16.mxu1 %v1764_v31 }
  0xb3   : > { %624 = vmatmul.mubr.bf16.gmra.mxu0 %v1761_v29 }
  0xb4   : > { %633 = vmatprep.mubr.bf16.mxu0 %v1980_v3 }
  0xb6   : > { %1578 = vmatmul.mubr.bf16.gmra.mxu1 %v1765_v33 }
  0xbb   : > { %634 = vmatmul.mubr.bf16.gmra.mxu0 %v1762_v30  ;;  %v308_v30 = vld [vmem:[#allocation2 + $0x120] sm:$0xff] }
  0xbc   : > { %643 = vmatprep.mubr.bf16.mxu0 %v1980_v3 }
  0xc3   : > { %644 = vmatmul.mubr.bf16.gmra.mxu0 %v1763_v32  ;;  %v321_v32 = vld [vmem:[#allocation2 + $0x60] sm:$0xff] }
  0xc4   : > { %653 = vmatprep.mubr.bf16.mxu0 %v1980_v3 }
  0xcb   : > { %654 = vmatmul.mubr.bf16.gmra.mxu0 %v1764_v31 }
  0xcc   : > { %663 = vmatprep.mubr.bf16.mxu0 %v1980_v3 }
  0xd3   : > { %664 = vmatmul.mubr.bf16.gmra.mxu0 %v1765_v33 }
 0x15b   : > { %v595_v35 = vpop.f32.mrf.mxu0 }
 0x15c   : > { %v771_v37 = vadd.f32 %v595_v35, %v289_v34 }
 0x15d   : > { %v597_v38 = vpop.f32.mrf.mxu0 }
 0x15e   : > { %819 = vst [vmem:[#allocation2 + $0xb0] sm:$0xff] %v771_v37  ;;  %v772_v40 = vadd.f32 %v597_v38, %v290_v36  ;;  %v1567_v53 = vpop.f32.mrf.mxu1  ;;  %v310_v36 = vld [vmem:[#allocation2 + $0xa8] sm:$0xff]  ;;  %v315_v38 = vld [vmem:[#allocation2 + $0x20] sm:$0xff] }
 0x15f   : > { %v599_v41 = vpop.f32.mrf.mxu0  ;;  %v779_v56 = vadd.f32 %v1567_v53, %v297_v49 }
 0x160   : > { %820 = vst [vmem:[#allocation2 + $0xd0] sm:$0xff] %v772_v40  ;;  %v774_v43 = vadd.f32 %v599_v41, %v292_v39  ;;  %v708_v59 = vpop.f32.mrf.mxu1 }
 0x161   : > { %v601_v44 = vpop.f32.mrf.mxu0  ;;  %827 = vst [vmem:[#allocation2 + $0x108] sm:$0xff] %v779_v56  ;;  %v773_v62 = vadd.f32 %v708_v59, %v291_v54  ;;  %v314_v54 = vld [vmem:[#allocation2 + $0xf8] sm:$0xff]  ;;  %v333_v56 = vld [vmem:[#allocation2 + $0x70] sm:$0xff] }
 0x162   : > { %822 = vst [vmem:[#allocation2 + $0x48] sm:$0xff] %v774_v43  ;;  %v775_v46 = vadd.f32 %v601_v44, %v293_v42  ;;  %v1568_v1 = vpop.f32.mrf.mxu1  ;;  %v311_v42 = vld [vmem:[#allocation2 + $0xb8] sm:$0xff] }
 0x163   : > { %v605_v47 = vpop.f32.mrf.mxu0  ;;  %821 = vst [vmem:[#allocation2 + $0x10] sm:$0xff] %v773_v62  ;;  %v782_v4 = vadd.f32 %v1568_v1, %v300_v60  ;;  %v324_v44 = vld [vmem:[#allocation2 + $0x38] sm:$0xff]  ;;  %v316_v60 = vld [vmem:[#allocation2 + $0x88] sm:$0xff] }
 0x164   : > { %823 = vst [vmem:[#allocation2 + $0x160] sm:$0xff] %v775_v46  ;;  %v777_v50 = vadd.f32 %v605_v47, %v295_v45  ;;  %v711_v7 = vpop.f32.mrf.mxu1  ;;  %v327_v62 = vld [vmem:[#allocation2 + $0x98] sm:$0xff] }
 0x165   : > { %v607_v51 = vpop.f32.mrf.mxu0  ;;  %830 = vst [vmem:[#allocation2 + $0x118] sm:$0xff] %v782_v4  ;;  %v776_v10 = vadd.f32 %v711_v7, %v294_v2  ;;  %v317_v2 = vld [vmem:[#allocation2 + $0xa0] sm:$0xff]  ;;  %v336_v4 = vld [vmem:[#allocation2 + $0x150] sm:$0xff] }
 0x166   : > { %825 = vst [vmem:[#allocation2 + $0x40] sm:$0xff] %v777_v50  ;;  %v778_v55 = vadd.f32 %v607_v51, %v296_v48  ;;  %v1571_v13 = vpop.f32.mrf.mxu1  ;;  %v313_v48 = vld [vmem:[#allocation2 + $0xe8] sm:$0xff]  ;;  %v318_v50 = vld [vmem:[#allocation2 + $0x170] sm:$0xff] }
 0x167   : > { %v609_v57 = vpop.f32.mrf.mxu0  ;;  %824 = vst [vmem:[#allocation2 + $0x128] sm:$0xff] %v776_v10  ;;  %v791_v16 = vadd.f32 %v1571_v13, %v309_v8  ;;  %v319_v8 = vld [vmem:[#allocation2 + $0xf0] sm:$0xff]  ;;  %v330_v10 = vld [vmem:[#allocation2 + $0x78] sm:$0xff] }
 0x168   : > { %826 = vst [vmem:[#allocation2 + $0x178] sm:$0xff] %v778_v55  ;;  %v780_v61 = vadd.f32 %v609_v57, %v298_v52  ;;  %v724_v19 = vpop.f32.mrf.mxu1 }
 0x169   : > { %v611_v63 = vpop.f32.mrf.mxu0  ;;  %839 = vst [vmem:[#allocation2 + $0xe0] sm:$0xff] %v791_v16  ;;  %v785_v22 = vadd.f32 %v724_v19, %v303_v14  ;;  %v320_v14 = vld [vmem:[#allocation2 + $0x140] sm:$0xff]  ;;  %v322_v19 = vld [vmem:[#allocation2 + $0xc8] sm:$0xff] }
 0x16a   : > { %828 = vst [vmem:[#allocation2 + $0x110] sm:$0xff] %v780_v61  ;;  %v781_v3 = vadd.f32 %v611_v63, %v299_v58  ;;  %v1572_v25 = vpop.f32.mrf.mxu1 }
 0x16b   : > { %v615_v5 = vpop.f32.mrf.mxu0  ;;  %833 = vst [vmem:[#allocation2 + $0x58] sm:$0xff] %v785_v22  ;;  %v794_v28 = vadd.f32 %v1572_v25, %v312_v20  ;;  %v323_v22 = vld [vmem:[#allocation2 + $0x28] sm:$0xff]  ;;  %v325_v25 = vld [vmem:[#allocation2 + $0xc0] sm:$0xff] }
 0x16c   : > { %829 = vst [vmem:[#allocation2 + $0x90] sm:$0xff] %v781_v3  ;;  %v783_v9 = vadd.f32 %v615_v5, %v301_v0  ;;  %v727_v31 = vpop.f32.mrf.mxu1 }
 0x16d   : > { %v617_v11 = vpop.f32.mrf.mxu0  ;;  %842 = vst [vmem:[#allocation2 + $0x168] sm:$0xff] %v794_v28  ;;  %v788_v34 = vadd.f32 %v727_v31, %v306_v26  ;;  %v326_v28 = vld [vmem:[#allocation2 + $0x18] sm:$0xff]  ;;  %v328_v31 = vld [vmem:[#allocation2 + $0x8] sm:$0xff] }
 0x16e   : > { %831 = vst [vmem:[#allocation2 + $0x148] sm:$0xff] %v783_v9  ;;  %v784_v15 = vadd.f32 %v617_v11, %v302_v6  ;;  %v1575_v37 = vpop.f32.mrf.mxu1 }
 0x16f   : > { %v619_v17 = vpop.f32.mrf.mxu0  ;;  %836 = vst [vmem:[#allocation2 + $0x130] sm:$0xff] %v788_v34  ;;  %v803_v40 = vadd.f32 %v1575_v37, %v321_v32  ;;  %v329_v34 = vld [vmem:[#allocation2] sm:$0xff]  ;;  %v331_v37 = vld [vmem:[#allocation2 + $0x50] sm:$0xff] }
 0x170   : > { %832 = vst [vmem:[#allocation2 + $0x100] sm:$0xff] %v784_v15  ;;  %v786_v21 = vadd.f32 %v619_v17, %v304_v12  ;;  %v740_v43 = vpop.f32.mrf.mxu1 }
 0x171   : > { %v621_v23 = vpop.f32.mrf.mxu0  ;;  %851 = vst [vmem:[#allocation2 + $0x60] sm:$0xff] %v803_v40  ;;  %v797_v46 = vadd.f32 %v740_v43, %v315_v38  ;;  %v332_v40 = vld [vmem:[#allocation2 + $0x68] sm:$0xff]  ;;  %v334_v43 = vld [vmem:[#allocation2 + $0x30] sm:$0xff] }
 0x172   : > { %834 = vst [vmem:[#allocation2 + $0xd8] sm:$0xff] %v786_v21  ;;  %v787_v27 = vadd.f32 %v621_v23, %v305_v18  ;;  %v1576_v49 = vpop.f32.mrf.mxu1 }
 0x173   : > { %v625_v29 = vpop.f32.mrf.mxu0  ;;  %845 = vst [vmem:[#allocation2 + $0x20] sm:$0xff] %v797_v46  ;;  %v806_v52 = vadd.f32 %v1576_v49, %v324_v44  ;;  %v335_v46 = vld [vmem:[#allocation2 + $0x158] sm:$0xff] }
 0x174   : > { %835 = vst [vmem:[#allocation2 + $0x80] sm:$0xff] %v787_v27  ;;  %v789_v33 = vadd.f32 %v625_v29, %v307_v24  ;;  %v743_v55 = vpop.f32.mrf.mxu1 }
 0x175   : > { %v627_v35 = vpop.f32.mrf.mxu0  ;;  %854 = vst [vmem:[#allocation2 + $0x38] sm:$0xff] %v806_v52  ;;  %v800_v58 = vadd.f32 %v743_v55, %v318_v50 }
 0x176   : > { %837 = vst [vmem:[#allocation2 + $0x138] sm:$0xff] %v789_v33  ;;  %v790_v39 = vadd.f32 %v627_v35, %v308_v30  ;;  %v1579_v61 = vpop.f32.mrf.mxu1 }
 0x177   : > { %v629_v41 = vpop.f32.mrf.mxu0  ;;  %848 = vst [vmem:[#allocation2 + $0x170] sm:$0xff] %v800_v58  ;;  %v815_v0 = vadd.f32 %v1579_v61, %v333_v56 }
 0x178   : > { %838 = vst [vmem:[#allocation2 + $0x120] sm:$0xff] %v790_v39  ;;  %v792_v45 = vadd.f32 %v629_v41, %v310_v36  ;;  %v756_v3 = vpop.f32.mrf.mxu1 }
 0x179   : > { %v631_v47 = vpop.f32.mrf.mxu0  ;;  %863 = vst [vmem:[#allocation2 + $0x70] sm:$0xff] %v815_v0  ;;  %v809_v6 = vadd.f32 %v756_v3, %v327_v62 }
 0x17a   : > { %840 = vst [vmem:[#allocation2 + $0xa8] sm:$0xff] %v792_v45  ;;  %v793_v51 = vadd.f32 %v631_v47, %v311_v42  ;;  %v1580_v9 = vpop.f32.mrf.mxu1 }
 0x17b   : > { %v635_v53 = vpop.f32.mrf.mxu0  ;;  %857 = vst [vmem:[#allocation2 + $0x98] sm:$0xff] %v809_v6  ;;  %v818_v12 = vadd.f32 %v1580_v9, %v336_v4 }
 0x17c   : > { %841 = vst [vmem:[#allocation2 + $0xb8] sm:$0xff] %v793_v51  ;;  %v795_v57 = vadd.f32 %v635_v53, %v313_v48  ;;  %v759_v15 = vpop.f32.mrf.mxu1 }
 0x17d   : > { %v637_v59 = vpop.f32.mrf.mxu0  ;;  %866 = vst [vmem:[#allocation2 + $0x150] sm:$0xff] %v818_v12  ;;  %v812_v17 = vadd.f32 %v759_v15, %v330_v10 }
 0x17e   : > { %843 = vst [vmem:[#allocation2 + $0xe8] sm:$0xff] %v795_v57  ;;  %v796_v63 = vadd.f32 %v637_v59, %v314_v54 }
 0x17f   : > { %v639_v1 = vpop.f32.mrf.mxu0  ;;  %860 = vst [vmem:[#allocation2 + $0x78] sm:$0xff] %v812_v17 }
 0x180   : > { %844 = vst [vmem:[#allocation2 + $0xf8] sm:$0xff] %v796_v63  ;;  %v798_v5 = vadd.f32 %v639_v1, %v316_v60 }
 0x181   : > { %v641_v7 = vpop.f32.mrf.mxu0 }
 0x182   : > { %846 = vst [vmem:[#allocation2 + $0x88] sm:$0xff] %v798_v5  ;;  %v799_v11 = vadd.f32 %v641_v7, %v317_v2 }
 0x183   : > { %v645_v13 = vpop.f32.mrf.mxu0 }
 0x184   : > { %847 = vst [vmem:[#allocation2 + $0xa0] sm:$0xff] %v799_v11  ;;  %v801_v16 = vadd.f32 %v645_v13, %v319_v8 }
 0x185   : > { %v647_v18 = vpop.f32.mrf.mxu0 }
 0x186   : > { %849 = vst [vmem:[#allocation2 + $0xf0] sm:$0xff] %v801_v16  ;;  %v802_v20 = vadd.f32 %v647_v18, %v320_v14 }
 0x187   : > { %v649_v21 = vpop.f32.mrf.mxu0 }
 0x188   : > { %850 = vst [vmem:[#allocation2 + $0x140] sm:$0xff] %v802_v20  ;;  %v804_v23 = vadd.f32 %v649_v21, %v322_v19 }
 0x189   : > { %v651_v24 = vpop.f32.mrf.mxu0 }
 0x18a   : > { %852 = vst [vmem:[#allocation2 + $0xc8] sm:$0xff] %v804_v23  ;;  %v805_v26 = vadd.f32 %v651_v24, %v323_v22 }
 0x18b   : > { %v655_v27 = vpop.f32.mrf.mxu0 }
 0x18c   : > { %853 = vst [vmem:[#allocation2 + $0x28] sm:$0xff] %v805_v26  ;;  %v807_v29 = vadd.f32 %v655_v27, %v325_v25 }
 0x18d   : > { %v657_v30 = vpop.f32.mrf.mxu0 }
 0x18e   : > { %855 = vst [vmem:[#allocation2 + $0xc0] sm:$0xff] %v807_v29  ;;  %v808_v32 = vadd.f32 %v657_v30, %v326_v28 }
 0x18f   : > { %v659_v33 = vpop.f32.mrf.mxu0 }
 0x190   : > { %856 = vst [vmem:[#allocation2 + $0x18] sm:$0xff] %v808_v32  ;;  %v810_v35 = vadd.f32 %v659_v33, %v328_v31 }
 0x191   : > { %v661_v36 = vpop.f32.mrf.mxu0 }
 0x192   : > { %858 = vst [vmem:[#allocation2 + $0x8] sm:$0xff] %v810_v35  ;;  %v811_v38 = vadd.f32 %v661_v36, %v329_v34 }
 0x193   : > { %v665_v39 = vpop.f32.mrf.mxu0 }
 0x194   : > { %859 = vst [vmem:[#allocation2] sm:$0xff] %v811_v38  ;;  %v813_v41 = vadd.f32 %v665_v39, %v331_v37 }
 0x195   : > { %v667_v42 = vpop.f32.mrf.mxu0 }
 0x196   : > { %861 = vst [vmem:[#allocation2 + $0x50] sm:$0xff] %v813_v41  ;;  %v814_v44 = vadd.f32 %v667_v42, %v332_v40 }
 0x197   : > { %v669_v45 = vpop.f32.mrf.mxu0 }
 0x198   : > { %862 = vst [vmem:[#allocation2 + $0x68] sm:$0xff] %v814_v44  ;;  %v816_v47 = vadd.f32 %v669_v45, %v334_v43  ;;  %870 = sbr.rel (%p1401_p4) target bundleno = 463 (0x1cf), region = 44 }
 0x199   : > { %v671_v48 = vpop.f32.mrf.mxu0 }
 0x19a   : > { %864 = vst [vmem:[#allocation2 + $0x30] sm:$0xff] %v816_v47  ;;  %v817_v49 = vadd.f32 %v671_v48, %v335_v46 }
 0x19c   : > { %865 = vst [vmem:[#allocation2 + $0x158] sm:$0xff] %v817_v49 }
 0x19d   : > { %v871_v50 = vld [vmem:[#allocation2 + $0xb0] sm:$0xff]  ;;  %v874_v53 = vld [vmem:[#allocation2 + $0x48] sm:$0xff]  ;;  %v875_v54 = vld [vmem:[#allocation2 + $0x160] sm:$0xff]  ;;  %v1981_v56 = vmov 0.0  }
 0x19e   : > { %v872_v51 = vld [vmem:[#allocation2 + $0xd0] sm:$0xff]  ;;  %v876_v55 = vld [vmem:[#allocation2 + $0x128] sm:$0xff]  ;;  %vm919_vm0 = vcmp.ge.f32.partialorder %v871_v50, 2.0  ;;  %vm922_vm3 = vcmp.ge.f32.partialorder %v874_v53, 2.0  ;;  %vm923_vm4 = vcmp.ge.f32.partialorder %v875_v54, 2.0  ;;  %v877_v58 = vld [vmem:[#allocation2 + $0x40] sm:$0xff] }
 0x19f   : > { %v873_v52 = vld [vmem:[#allocation2 + $0x10] sm:$0xff]  ;;  %vm920_vm1 = vcmp.ge.f32.partialorder %v872_v51, 2.0  ;;  %vm924_vm5 = vcmp.ge.f32.partialorder %v876_v55, 2.0  ;;  %v1402_v57 = vsel %vm919_vm0, 1.0, %v1981_v56  ;;  %v878_v59 = vld [vmem:[#allocation2 + $0x178] sm:$0xff]  ;;  %v1405_v62 = vsel %vm922_vm3, 1.0, %v1981_v56 }
 0x1a0   : > { %vm921_vm2 = vcmp.ge.f32.partialorder %v873_v52, 2.0  ;;  %v1403_v60 = vsel %vm920_vm1, 1.0, %v1981_v56  ;;  %v1406_v63 = vsel %vm923_vm4, 1.0, %v1981_v56  ;;  %v879_v0 = vld [vmem:[#allocation2 + $0x108] sm:$0xff]  ;;  %v880_v1 = vld [vmem:[#allocation2 + $0x110] sm:$0xff]  ;;  %v1407_v2 = vsel %vm924_vm5, 1.0, %v1981_v56 }
 0x1a1   : > { %v1404_v61 = vsel %vm921_vm2, 1.0, %v1981_v56  ;;  %v1063_v3 = vadd.f32 %v1403_v60, %v1402_v57  ;;  %v1064_v4 = vadd.f32 %v1406_v63, %v1405_v62  ;;  %v881_v5 = vld [vmem:[#allocation2 + $0x90] sm:$0xff]  ;;  %v882_v6 = vld [vmem:[#allocation2 + $0x118] sm:$0xff]  ;;  %vm925_vm6 = vcmp.ge.f32.partialorder %v877_v58, 2.0  ;;  %v883_v10 = vld [vmem:[#allocation2 + $0x148] sm:$0xff] }
 0x1a2   : > { %vm926_vm7 = vcmp.ge.f32.partialorder %v878_v59, 2.0  ;;  %vm927_vm8 = vcmp.ge.f32.partialorder %v879_v0, 2.0  ;;  %vm928_vm9 = vcmp.ge.f32.partialorder %v880_v1, 2.0  ;;  %vm929_vm10 = vcmp.ge.f32.partialorder %v881_v5, 2.0  ;;  %v884_v15 = vld [vmem:[#allocation2 + $0x100] sm:$0xff]  ;;  %v885_v16 = vld [vmem:[#allocation2 + $0x58] sm:$0xff] }
 0x1a3   : > { %v1079_v7 = vadd.f32 %v1404_v61, %v1063_v3  ;;  %v1080_v8 = vadd.f32 %v1407_v2, %v1064_v4  ;;  %vm930_vm11 = vcmp.ge.f32.partialorder %v882_v6, 2.0  ;;  %v1408_v9 = vsel %vm925_vm6, 1.0, %v1981_v56  ;;  %v886_v19 = vld [vmem:[#allocation2 + $0xd8] sm:$0xff]  ;;  %v887_v20 = vld [vmem:[#allocation2 + $0x80] sm:$0xff]  ;;  %v888_v21 = vld [vmem:[#allocation2 + $0x130] sm:$0xff] }
 0x1a4   : > { %v1409_v11 = vsel %vm926_vm7, 1.0, %v1981_v56  ;;  %v1410_v12 = vsel %vm927_vm8, 1.0, %v1981_v56  ;;  %v1411_v13 = vsel %vm928_vm9, 1.0, %v1981_v56  ;;  %v1412_v14 = vsel %vm929_vm10, 1.0, %v1981_v56  ;;  %v889_v28 = vld [vmem:[#allocation2 + $0x138] sm:$0xff]  ;;  %v890_v32 = vld [vmem:[#allocation2 + $0x120] sm:$0xff] }
 0x1a5   : > { %vm1095_vm12 = vcmp.ge.f32.partialorder %v1079_v7, 1.0  ;;  %vm1096_vm13 = vcmp.ge.f32.partialorder %v1080_v8, 1.0  ;;  %v1413_v17 = vsel %vm930_vm11, 1.0, %v1981_v56  ;;  %v1065_v18 = vadd.f32 %v1409_v11, %v1408_v9  ;;  %v891_v33 = vld [vmem:[#allocation2 + $0xe0] sm:$0xff]  ;;  %v892_v37 = vld [vmem:[#allocation2 + $0xa8] sm:$0xff]  ;;  %v893_v38 = vld [vmem:[#allocation2 + $0xb8] sm:$0xff] }
 0x1a6   : > { %v1450_v22 = vsel %vm1095_vm12, 1.0, %v1981_v56  ;;  %v1451_v23 = vsel %vm1096_vm13, 1.0, %v1981_v56  ;;  %v1066_v24 = vadd.f32 %v1412_v14, %v1411_v13  ;;  %vm931_vm14 = vcmp.ge.f32.partialorder %v883_v10, 2.0  ;;  %v894_v43 = vld [vmem:[#allocation2 + $0x168] sm:$0xff]  ;;  %v896_v51 = vld [vmem:[#allocation2 + $0xf8] sm:$0xff]  ;;  %v897_v52 = vld [vmem:[#allocation2 + $0x20] sm:$0xff] }
 0x1a7   : > { %v1503_v25 = vpack.c.bf16 %v1451_v23, %v1450_v22  ;;  %v1081_v26 = vadd.f32 %v1410_v12, %v1065_v18  ;;  %vm932_vm15 = vcmp.ge.f32.partialorder %v884_v15, 2.0  ;;  %vm933_vm0 = vcmp.ge.f32.partialorder %v885_v16, 2.0  ;;  %v895_v47 = vld [vmem:[#allocation2 + $0xe8] sm:$0xff]  ;;  %v899_v57 = vld [vmem:[#allocation2 + $0xa0] sm:$0xff]  ;;  %v900_v62 = vld [vmem:[#allocation2 + $0x170] sm:$0xff] }
 0x1a8   : > { %v1082_v27 = vadd.f32 %v1413_v17, %v1066_v24  ;;  %vm934_vm1 = vcmp.ge.f32.partialorder %v886_v19, 2.0  ;;  %vm935_vm2 = vcmp.ge.f32.partialorder %v887_v20, 2.0  ;;  %vm936_vm3 = vcmp.ge.f32.partialorder %v888_v21, 2.0  ;;  %v898_v55 = vld [vmem:[#allocation2 + $0x88] sm:$0xff]  ;;  %v901_v5 = vld [vmem:[#allocation2 + $0xf0] sm:$0xff]  ;;  %v902_v6 = vld [vmem:[#allocation2 + $0x140] sm:$0xff] }
 0x1a9   : > { %1504 = vst [vmem:[%s2223_s19] sm:$0xff] %v1503_v25   ;;  %vm1097_vm4 = vcmp.ge.f32.partialorder %v1081_v26, 1.0  ;;  %v1414_v29 = vsel %vm931_vm14, 1.0, %v1981_v56  ;;  %v1415_v30 = vsel %vm932_vm15, 1.0, %v1981_v56  ;;  %v1416_v31 = vsel %vm933_vm0, 1.0, %v1981_v56  ;;  %v903_v10 = vld [vmem:[#allocation2 + $0x60] sm:$0xff]  ;;  %v904_v11 = vld [vmem:[#allocation2 + $0xc8] sm:$0xff] }
 0x1aa   : > { %vm1098_vm5 = vcmp.ge.f32.partialorder %v1082_v27, 1.0  ;;  %v1452_v34 = vsel %vm1097_vm4, 1.0, %v1981_v56  ;;  %v1417_v35 = vsel %vm934_vm1, 1.0, %v1981_v56  ;;  %v1418_v36 = vsel %vm935_vm2, 1.0, %v1981_v56  ;;  %v905_v15 = vld [vmem:[#allocation2 + $0x28] sm:$0xff]  ;;  %v906_v16 = vld [vmem:[#allocation2 + $0x38] sm:$0xff] }
 0x1ab   : > { %v1453_v39 = vsel %vm1098_vm5, 1.0, %v1981_v56  ;;  %v1419_v40 = vsel %vm936_vm3, 1.0, %v1981_v56  ;;  %v1067_v41 = vadd.f32 %v1415_v30, %v1414_v29  ;;  %v1068_v42 = vadd.f32 %v1418_v36, %v1417_v35  ;;  %v907_v23 = vld [vmem:[#allocation2 + $0xc0] sm:$0xff]  ;;  %v908_v24 = vld [vmem:[#allocation2 + $0x18] sm:$0xff]  ;;  %v910_v29 = vld [vmem:[#allocation2 + $0x8] sm:$0xff] }
 0x1ac   : > { %v1506_v44 = vpack.c.bf16 %v1453_v39, %v1452_v34  ;;  %vm937_vm6 = vcmp.ge.f32.partialorder %v889_v28, 2.0  ;;  %vm938_vm7 = vcmp.ge.f32.partialorder %v890_v32, 2.0  ;;  %vm939_vm8 = vcmp.ge.f32.partialorder %v891_v33, 2.0  ;;  %v909_v28 = vld [vmem:[#allocation2 + $0x98] sm:$0xff]  ;;  %v911_v33 = vld [vmem:[#allocation2] sm:$0xff] }
 0x1ad   : > { %v1083_v45 = vadd.f32 %v1416_v31, %v1067_v41  ;;  %v1084_v46 = vadd.f32 %v1419_v40, %v1068_v42  ;;  %vm940_vm9 = vcmp.ge.f32.partialorder %v892_v37, 2.0  ;;  %vm941_vm10 = vcmp.ge.f32.partialorder %v893_v38, 2.0  ;;  %v912_v34 = vld [vmem:[#allocation2 + $0x78] sm:$0xff]  ;;  %v913_v41 = vld [vmem:[#allocation2 + $0x50] sm:$0xff] }
 0x1ae   : > { %1526 = vst [vmem:[%s2223_s19 + $0x8] sm:$0xff] %v1506_v44   ;;  %vm942_vm11 = vcmp.ge.f32.partialorder %v894_v43, 2.0  ;;  %v1420_v48 = vsel %vm937_vm6, 1.0, %v1981_v56  ;;  %v1421_v49 = vsel %vm938_vm7, 1.0, %v1981_v56  ;;  %v1422_v50 = vsel %vm939_vm8, 1.0, %v1981_v56 }
 0x1af   : > { %vm1099_vm12 = vcmp.ge.f32.partialorder %v1083_v45, 1.0  ;;  %vm1100_vm13 = vcmp.ge.f32.partialorder %v1084_v46, 1.0  ;;  %v1423_v53 = vsel %vm940_vm9, 1.0, %v1981_v56  ;;  %v1424_v54 = vsel %vm941_vm10, 1.0, %v1981_v56  ;;  %v914_v46 = vld [vmem:[#allocation2 + $0x68] sm:$0xff] }
 0x1b0   : > { %v1454_v58 = vsel %vm1099_vm12, 1.0, %v1981_v56  ;;  %v1455_v59 = vsel %vm1100_vm13, 1.0, %v1981_v56  ;;  %v1425_v60 = vsel %vm942_vm11, 1.0, %v1981_v56  ;;  %v1069_v61 = vadd.f32 %v1421_v49, %v1420_v48 }
 0x1b1   : > { %v1509_v63 = vpack.c.bf16 %v1455_v59, %v1454_v58  ;;  %v1070_v0 = vadd.f32 %v1424_v54, %v1423_v53  ;;  %vm943_vm14 = vcmp.ge.f32.partialorder %v895_v47, 2.0  ;;  %vm944_vm15 = vcmp.ge.f32.partialorder %v896_v51, 2.0  ;;  %v915_v47 = vld [vmem:[#allocation2 + $0x70] sm:$0xff]  ;;  %v917_v51 = vld [vmem:[#allocation2 + $0x158] sm:$0xff] }
 0x1b2   : > { %v1085_v1 = vadd.f32 %v1422_v50, %v1069_v61  ;;  %vm945_vm0 = vcmp.ge.f32.partialorder %v897_v52, 2.0  ;;  %vm946_vm1 = vcmp.ge.f32.partialorder %v898_v55, 2.0  ;;  %vm947_vm2 = vcmp.ge.f32.partialorder %v899_v57, 2.0  ;;  %v916_v50 = vld [vmem:[#allocation2 + $0x30] sm:$0xff] }
 0x1b3   : > { %1527 = vst [vmem:[%s2223_s19 + $0x10] sm:$0xff] %v1509_v63   ;;  %v1086_v2 = vadd.f32 %v1425_v60, %v1070_v0  ;;  %vm948_vm3 = vcmp.ge.f32.partialorder %v900_v62, 2.0  ;;  %v1426_v3 = vsel %vm943_vm14, 1.0, %v1981_v56  ;;  %v1427_v4 = vsel %vm944_vm15, 1.0, %v1981_v56  ;;  %v918_v57 = vld [vmem:[#allocation2 + $0x150] sm:$0xff] }
 0x1b4   : > { %vm1101_vm4 = vcmp.ge.f32.partialorder %v1085_v1, 1.0  ;;  %v1428_v7 = vsel %vm945_vm0, 1.0, %v1981_v56  ;;  %v1429_v8 = vsel %vm946_vm1, 1.0, %v1981_v56  ;;  %v1430_v9 = vsel %vm947_vm2, 1.0, %v1981_v56 }
 0x1b5   : > { %vm1102_vm5 = vcmp.ge.f32.partialorder %v1086_v2, 1.0  ;;  %v1456_v12 = vsel %vm1101_vm4, 1.0, %v1981_v56  ;;  %v1431_v13 = vsel %vm948_vm3, 1.0, %v1981_v56  ;;  %v1071_v14 = vadd.f32 %v1427_v4, %v1426_v3 }
 0x1b6   : > { %v1457_v17 = vsel %vm1102_vm5, 1.0, %v1981_v56  ;;  %v1072_v18 = vadd.f32 %v1430_v9, %v1429_v8  ;;  %vm949_vm6 = vcmp.ge.f32.partialorder %v901_v5, 2.0  ;;  %vm950_vm7 = vcmp.ge.f32.partialorder %v902_v6, 2.0 }
 0x1b7   : > { %v1512_v19 = vpack.c.bf16 %v1457_v17, %v1456_v12  ;;  %v1087_v20 = vadd.f32 %v1428_v7, %v1071_v14  ;;  %vm951_vm8 = vcmp.ge.f32.partialorder %v903_v10, 2.0  ;;  %vm952_vm9 = vcmp.ge.f32.partialorder %v904_v11, 2.0 }
 0x1b8   : > { %v1088_v21 = vadd.f32 %v1431_v13, %v1072_v18  ;;  %vm953_vm10 = vcmp.ge.f32.partialorder %v905_v15, 2.0  ;;  %vm954_vm11 = vcmp.ge.f32.partialorder %v906_v16, 2.0  ;;  %v1432_v22 = vsel %vm949_vm6, 1.0, %v1981_v56 }
 0x1b9   : > { %1528 = vst [vmem:[%s2223_s19 + $0x18] sm:$0xff] %v1512_v19   ;;  %vm1103_vm12 = vcmp.ge.f32.partialorder %v1087_v20, 1.0  ;;  %v1433_v25 = vsel %vm950_vm7, 1.0, %v1981_v56  ;;  %v1434_v26 = vsel %vm951_vm8, 1.0, %v1981_v56  ;;  %v1435_v27 = vsel %vm952_vm9, 1.0, %v1981_v56 }
 0x1ba   : > { %vm1104_vm13 = vcmp.ge.f32.partialorder %v1088_v21, 1.0  ;;  %v1458_v30 = vsel %vm1103_vm12, 1.0, %v1981_v56  ;;  %v1436_v31 = vsel %vm953_vm10, 1.0, %v1981_v56  ;;  %v1437_v32 = vsel %vm954_vm11, 1.0, %v1981_v56 }
 0x1bb   : > { %v1459_v35 = vsel %vm1104_vm13, 1.0, %v1981_v56  ;;  %v1073_v36 = vadd.f32 %v1433_v25, %v1432_v22  ;;  %v1074_v37 = vadd.f32 %v1436_v31, %v1435_v27  ;;  %vm955_vm14 = vcmp.ge.f32.partialorder %v907_v23, 2.0 }
 0x1bc   : > { %v1515_v38 = vpack.c.bf16 %v1459_v35, %v1458_v30  ;;  %vm956_vm15 = vcmp.ge.f32.partialorder %v908_v24, 2.0  ;;  %vm957_vm0 = vcmp.ge.f32.partialorder %v909_v28, 2.0  ;;  %vm958_vm1 = vcmp.ge.f32.partialorder %v910_v29, 2.0 }
 0x1bd   : > { %v1089_v39 = vadd.f32 %v1434_v26, %v1073_v36  ;;  %v1090_v40 = vadd.f32 %v1437_v32, %v1074_v37  ;;  %vm959_vm2 = vcmp.ge.f32.partialorder %v911_v33, 2.0  ;;  %vm960_vm3 = vcmp.ge.f32.partialorder %v912_v34, 2.0 }
 0x1be   : > { %1529 = vst [vmem:[%s2223_s19 + $0x20] sm:$0xff] %v1515_v38   ;;  %v1438_v42 = vsel %vm955_vm14, 1.0, %v1981_v56  ;;  %v1439_v43 = vsel %vm956_vm15, 1.0, %v1981_v56  ;;  %v1440_v44 = vsel %vm957_vm0, 1.0, %v1981_v56  ;;  %v1441_v45 = vsel %vm958_vm1, 1.0, %v1981_v56 }
 0x1bf   : > { %vm1105_vm4 = vcmp.ge.f32.partialorder %v1089_v39, 1.0  ;;  %vm1106_vm5 = vcmp.ge.f32.partialorder %v1090_v40, 1.0  ;;  %v1442_v48 = vsel %vm959_vm2, 1.0, %v1981_v56  ;;  %v1443_v49 = vsel %vm960_vm3, 1.0, %v1981_v56 }
 0x1c0   : > { %v1460_v52 = vsel %vm1105_vm4, 1.0, %v1981_v56  ;;  %v1461_v53 = vsel %vm1106_vm5, 1.0, %v1981_v56  ;;  %v1075_v54 = vadd.f32 %v1439_v43, %v1438_v42  ;;  %v1076_v55 = vadd.f32 %v1442_v48, %v1441_v45 }
 0x1c1   : > { %v1518_v58 = vpack.c.bf16 %v1461_v53, %v1460_v52  ;;  %vm961_vm6 = vcmp.ge.f32.partialorder %v913_v41, 2.0  ;;  %vm962_vm7 = vcmp.ge.f32.partialorder %v914_v46, 2.0  ;;  %vm963_vm8 = vcmp.ge.f32.partialorder %v915_v47, 2.0 }
 0x1c2   : > { %v1091_v59 = vadd.f32 %v1440_v44, %v1075_v54  ;;  %v1092_v60 = vadd.f32 %v1443_v49, %v1076_v55  ;;  %vm964_vm9 = vcmp.ge.f32.partialorder %v916_v50, 2.0  ;;  %vm965_vm10 = vcmp.ge.f32.partialorder %v917_v51, 2.0 }
 0x1c3   : > { %1530 = vst [vmem:[%s2223_s19 + $0x28] sm:$0xff] %v1518_v58   ;;  %vm966_vm11 = vcmp.ge.f32.partialorder %v918_v57, 2.0  ;;  %v1444_v61 = vsel %vm961_vm6, 1.0, %v1981_v56  ;;  %v1445_v62 = vsel %vm962_vm7, 1.0, %v1981_v56  ;;  %v1446_v63 = vsel %vm963_vm8, 1.0, %v1981_v56 }
 0x1c4   : > { %vm1107_vm12 = vcmp.ge.f32.partialorder %v1091_v59, 1.0  ;;  %vm1108_vm13 = vcmp.ge.f32.partialorder %v1092_v60, 1.0  ;;  %v1447_v0 = vsel %vm964_vm9, 1.0, %v1981_v56  ;;  %v1448_v1 = vsel %vm965_vm10, 1.0, %v1981_v56 }
 0x1c5   : > { %v1462_v2 = vsel %vm1107_vm12, 1.0, %v1981_v56  ;;  %v1463_v3 = vsel %vm1108_vm13, 1.0, %v1981_v56  ;;  %v1449_v4 = vsel %vm966_vm11, 1.0, %v1981_v56  ;;  %v1077_v5 = vadd.f32 %v1445_v62, %v1444_v61 }
 0x1c6   : > { %v1521_v6 = vpack.c.bf16 %v1463_v3, %v1462_v2  ;;  %v1078_v7 = vadd.f32 %v1448_v1, %v1447_v0 }
 0x1c7   : > { %v1093_v8 = vadd.f32 %v1446_v63, %v1077_v5 }
 0x1c8   : > { %1531 = vst [vmem:[%s2223_s19 + $0x30] sm:$0xff] %v1521_v6   ;;  %v1094_v9 = vadd.f32 %v1449_v4, %v1078_v7 }
 0x1c9   : > { %vm1109_vm14 = vcmp.ge.f32.partialorder %v1093_v8, 1.0 }
 0x1ca   : > { %vm1110_vm15 = vcmp.ge.f32.partialorder %v1094_v9, 1.0  ;;  %v1464_v10 = vsel %vm1109_vm14, 1.0, %v1981_v56 }
 0x1cb   : > { %v1465_v11 = vsel %vm1110_vm15, 1.0, %v1981_v56 }
 0x1cc   : > { %v1524_v12 = vpack.c.bf16 %v1465_v11, %v1464_v10 }
 0x1ce   : > { %1532 = vst [vmem:[%s2223_s19 + $0x38] sm:$0xff] %v1524_v12  }
 0x1cf PF: > { %s2466_s18 = sld [smem:[#allocation14_spill]]  ;;  %s1239_s2 = sshll.u32 %s2223_s19, 4  ;;  %s2347_s2 = int_to_ptr.vmem [resolvable:$true] %s1239_s2 }
 0x1d0   : > { %s2467_s15 = sld [smem:[#allocation22_spill]]  ;;  %s2351_s0 = scalar_lea.sflag [#allocation5], %s229_s4 }
 0x1d1   : > { %s1822_s17 = scalar_lea.vmem %s2347_s2, 1024  ;;  %s1982_s27 = smov [#allocation8]  }
 0x1d2   : > { %p1823_p10 = scmp.ne.s32.totalorder %s2347_s2, %s1822_s17  ;;  %s1826_s21 = sshll.u32 %s1982_s27, 4  ;;  %s1827_s21 = int_to_ptr.vmem [resolvable:$false] %s1826_s21 }
 0x1d3   : > { %s1828_s30 = scalar_lea.vmem %s1827_s21, 2048  ;;  %p1829_p9 = scmp.lt.s32.totalorder %s2347_s2, %s1827_s21 }
 0x1d4   : > { %p1824_p7 = pnand %p1823_p10, %p2171_p13  ;;  %p1830_p1 = scmp.lt.s32.totalorder %s1828_s30, %s1822_s17 }
 0x1d5   : > { %s1483_s3 = sshll.u32 %s2466_s18, 6 }
 0x1d6   : > { %s2468_s25 = smov %s2467_s15  ;;  %s2344_s24 = scalar_lea.hbm %s2467_s15, %s1483_s3 }
 0x1d7   : > { %p1825_p12 = pneg %p1824_p7  ;;  %p1831_p0 = por %p1830_p1, %p1829_p9 }
 0x1d9   : > { %p1832_p6 = pnand %p1831_p0, %p1825_p12 }
 0x1db   : > { %1835 = shalt.err (!%p1832_p6)
}
 0x1dc   : > { %s1836_s5 = scalar_lea.hbm %s2344_s24, 1024  ;;  %s1840_s7 = scalar_lea.hbm %s2468_s25, 2048 }
 0x1dd   : > { %p1837_p2 = scmp.ne.s32.totalorder %s2344_s24, %s1836_s5  ;;  %p1841_p8 = scmp.lt.s32.totalorder %s2344_s24, %s2468_s25 }
 0x1de   : > { %p1842_p4 = scmp.lt.s32.totalorder %s1840_s7, %s1836_s5 }
 0x1df   : > { %p1838_p3 = pnand %p1837_p2, %p2171_p13 }
 0x1e0   : > { %p1843_p10 = por %p1842_p4, %p1841_p8 }
 0x1e1   : > { %p1839_p11 = pneg %p1838_p3 }
 0x1e3   : > { %p1844_p7 = pnand %p1843_p10, %p1839_p11 }
 0x1e5   : > { %1847 = shalt.err (!%p1844_p7)
}
 0x1e6   : > { %s1983_s28 = smov 64   ;;  %s1984_s19 = smov 128  }
 0x1e7   : > { %s1985_s18 = smov 4  }
 0x1e8   : > { %1588 = dma.vmem_to_hbm [thread:$0]  (%p2171_p13), %s2347_s2, 1024, %s2344_s24, %s2351_s0, %s1983_s28, %s1984_s19, %s1985_s18  }
 0x1e9 PF: > { %p1602_p12 = scmp.ge.s32.totalorder %s1970_s22, 2  ;;  %s1254_s3 = sand.u32 1, %s1918_s9  }
 0x1ea   : > { %s1255_s23 = scalar_lea.sflag [#allocation5], %s1254_s3 }
 0x1eb   : > { %p1598_p9 = pnand %p1602_p12, %p2181_p5 }
 0x1ed   : > { %p1599_p1 = pneg %p1598_p9 }
 0x1ef   : > { %1913 = dma.done.wait (%p1599_p1), %s1255_s23, 1024  }
 0x1f0   : > { %1915 = vsyncadd (%p1599_p1), %s1255_s23, 4294966272  ;;  %s21_s22 = sadd.s32 1, %s1970_s22   ;;  %s2470_s29 = sld [smem:[#allocation12_spill]] }
 0x1f1   : > { %p2379_p0 = scmp.ge.s32.totalorder %s21_s22, 8   ;;  %s2471_s14 = sld [smem:[#allocation20_spill]] }
 0x1f2   : > { %s2472_s24 = sld [smem:[#allocation13_spill]]  ;;  %s2479_s9 = smov %s1922_s10 }
 0x1f3   : > { %s2473_s17 = sld [smem:[#allocation18_spill]]  ;;  %s2480_s10 = smov %s1926_s11 }
 0x1f4   : > { %s2474_s18 = sld [smem:[#allocation15_spill]]  ;;  %s2481_s11 = smov %s2176_s26 }
 0x1f5   : > { %s2475_s19 = sld [smem:[#allocation16_spill]]  ;;  %s2482_s12 = smov %s1934_s13 }
 0x1f6   : > { %s2476_s20 = sld [smem:[#allocation17_spill]]  ;;  %s2483_s13 = smov %s2470_s29 }
 0x1f7   : > { %s2477_s21 = sld [smem:[#allocation19_spill]]  ;;  %s2484_s15 = smov %s1946_s16 }
 0x1f8   : > { %s2485_s16 = smov %s2472_s24  ;;  %20 = sbr.rel (!%p2379_p0) target bundleno = 15 (0xf), region = 94 }
 0x1fd   :  { %1260 = vsyncpa [#allocation4], 1 }
 0x1fe   :  { %1262 = vsyncpa [#allocation4 + $0x1], 1 }
 0x1ff   :  { %1263 = vsyncpa [#allocation7], 1 }
 0x200   :  { %1265 = vsyncpa [#allocation7 + $0x1], 1 }
 0x201   :  { %1266 = vsyncpa [#allocation5], 1 }
 0x202   :  { %1268 = vsyncpa [#allocation5 + $0x1], 1 }

</bundles_post_ra>
